<compile_context>
chip_gen: v5e
topology: v5e:2x2
jax: 0.10.0
libtpu: 0.0.40
codegen_flags: <defaults>
</compile_context>

<pallas_src>
import functools

import jax
import jax.numpy as jnp
from jax.experimental import pallas as pl
from jax.experimental.pallas import tpu as pltpu


_VMEM_LIMIT_BYTES = 48 * 1024 * 1024   # safe on v5e/v6e (128 MiB) and v7x (64 MiB)


def _pick_time_tile(L, halo):
    """Largest lane-aligned time tile (<=1024) that divides L and covers the halo."""
    for T in (1024, 512, 256, 128):
        if T < L and L % T == 0 and T >= halo:
            return T
    return L


# ---------------------------------------------------------------------------
# Fused TemporalBlock kernel
# ---------------------------------------------------------------------------

def _temporal_block_kernel(*refs, dilation, K, T, pad, num_t_tiles, has_down):
    if has_down:
        (x_ref, w1_ref, b1_ref, w2_ref, b2_ref, wd_ref, bd_ref,
         o_ref, xp_s, h_s) = refs
    else:
        (x_ref, w1_ref, b1_ref, w2_ref, b2_ref, o_ref, xp_s, h_s) = refs
        wd_ref = bd_ref = None

    d = dilation
    pad2 = 2 * pad          # input halo: conv1 halo (pad) + conv2 halo (pad)
    Th = T + pad            # conv1 output tile incl. left halo needed by conv2
    cin = xp_s.shape[0]
    j = pl.program_id(1)

    # --- stage 0: causally padded input window -> VMEM scratch --------------
    # xp_s[:, i] == x_padded[:, j*T + i] where x_padded has 2*pad leading zeros
    # (equivalent to conv padding + Chomp1d of both convs). No HBM pad copy.
    if pad2 == 0:
        if num_t_tiles == 1:
            xp_s[...] = x_ref[0]
        else:
            xp_s[...] = x_ref[0, :, pl.ds(j * T, T)]
    elif num_t_tiles == 1:
        xp_s[:, 0:pad2] = jnp.zeros((cin, pad2), xp_s.dtype)
        xp_s[:, pad2:pad2 + T] = x_ref[0]
    else:
        @pl.when(j == 0)
        def _():
            xp_s[:, 0:pad2] = jnp.zeros((cin, pad2), xp_s.dtype)
            xp_s[:, pad2:pad2 + T] = x_ref[0, :, 0:T]

        @pl.when(j > 0)
        def _():
            xp_s[...] = x_ref[0, :, pl.ds(j * T - pad2, T + pad2)]

    # --- stage 1: conv1 + bias + ReLU  (one K*Cin-deep MXU matmul) -----------
    if K > 1:
        x1 = jnp.concatenate([xp_s[:, k * d:k * d + Th] for k in range(K)], axis=0)
    else:
        x1 = xp_s[:, 0:Th]
    h = jnp.dot(w1_ref[...], x1, preferred_element_type=jnp.float32)
    h = jnp.maximum(h + b1_ref[...], 0.0)
    if pad > 0:
        # Halo positions before t=0 must be the *zero padding* conv2 expects,
        # not relu(b1).
        t_idx = jax.lax.broadcasted_iota(jnp.int32, h.shape, 1)
        h = jnp.where(t_idx + j * T >= pad, h, 0.0)
    h_s[...] = h.astype(h_s.dtype)

    # --- stage 2: conv2 + bias + ReLU, fused residual (+1x1) + final ReLU ----
    if K > 1:
        x2 = jnp.concatenate([h_s[:, k * d:k * d + T] for k in range(K)], axis=0)
    else:
        x2 = h_s[:, 0:T]
    y = jnp.dot(w2_ref[...], x2, preferred_element_type=jnp.float32)
    y = jnp.maximum(y + b2_ref[...], 0.0)

    xres = xp_s[:, pad2:pad2 + T]
    if has_down:
        res = jnp.dot(wd_ref[...], xres, preferred_element_type=jnp.float32)
        res = res + bd_ref[...]
    else:
        res = xres.astype(jnp.float32)

    o_ref[0] = jnp.maximum(y + res, 0.0).astype(o_ref.dtype)


def temporal_block(x, w1, b1, w2, b2, wd, bd, dilation):
    """Fused TemporalBlock forward.

    x  : (N, Cin, L)   activations (NCL layout, as in PyTorch)
    w1 : (Cout, Cin, K),  b1: (Cout,)   first dilated causal conv
    w2 : (Cout, Cout, K), b2: (Cout,)   second dilated causal conv
    wd : (Cout, Cin, 1) or None, bd: (Cout,) or None   1x1 downsample
    """
    N, Cin, L = x.shape
    Cout, _, K = w1.shape
    pad = (K - 1) * dilation
    T = _pick_time_tile(L, 2 * pad)
    Jt = L // T
    dt = x.dtype

    # Weights reshaped so each conv is one (Cout, K*C) x (K*C, T) matmul.
    w1s = jnp.transpose(w1, (0, 2, 1)).reshape(Cout, K * Cin).astype(dt)
    w2s = jnp.transpose(w2, (0, 2, 1)).reshape(Cout, K * Cout).astype(dt)
    b1c = b1.reshape(Cout, 1).astype(jnp.float32)
    b2c = b2.reshape(Cout, 1).astype(jnp.float32)

    has_down = wd is not None
    args = [x, w1s, b1c, w2s, b2c]
    in_specs = [
        pl.BlockSpec((1, Cin, L), lambda n, j: (n, 0, 0)),       # full-L input row
        pl.BlockSpec((Cout, K * Cin), lambda n, j: (0, 0)),
        pl.BlockSpec((Cout, 1), lambda n, j: (0, 0)),
        pl.BlockSpec((Cout, K * Cout), lambda n, j: (0, 0)),
        pl.BlockSpec((Cout, 1), lambda n, j: (0, 0)),
    ]
    if has_down:
        args += [wd[:, :, 0].astype(dt), bd.reshape(Cout, 1).astype(jnp.float32)]
        in_specs += [
            pl.BlockSpec((Cout, Cin), lambda n, j: (0, 0)),
            pl.BlockSpec((Cout, 1), lambda n, j: (0, 0)),
        ]

    kernel = functools.partial(
        _temporal_block_kernel, dilation=dilation, K=K, T=T, pad=pad,
        num_t_tiles=Jt, has_down=has_down)

    return pl.pallas_call(
        kernel,
        out_shape=jax.ShapeDtypeStruct((N, Cout, L), dt),
        grid=(N, Jt),
        in_specs=in_specs,
        out_specs=pl.BlockSpec((1, Cout, T), lambda n, j: (n, 0, j)),
        scratch_shapes=[
            pltpu.VMEM((Cin, T + 2 * pad), dt),   # padded input window
            pltpu.VMEM((Cout, T + pad), dt),      # conv1 output (+ left halo)
        ],
        compiler_params=pltpu.CompilerParams(
            dimension_semantics=("parallel", "parallel"),
            vmem_limit_bytes=_VMEM_LIMIT_BYTES),
    )(*args)


# ---------------------------------------------------------------------------
# Parameter init + TCN forward (glue in plain JAX)
# ---------------------------------------------------------------------------

def apply_weight_norm(v, g):
    """PyTorch weight_norm: w = g * v / ||v||  (norm per output channel)."""
    norm = jnp.sqrt(jnp.sum(v * v, axis=(1, 2), keepdims=True))
    return g.reshape(-1, 1, 1) * v / norm


def init_tcn_params(key, num_inputs, num_channels, kernel_size):
    params = []
    for i, cout in enumerate(num_channels):
        cin = num_inputs if i == 0 else num_channels[i - 1]
        key, k0, k1, k2, k3, k4, k5 = jax.random.split(key, 7)
        v1 = 0.01 * jax.random.normal(k0, (cout, cin, kernel_size), jnp.float32)
        g1 = jnp.sqrt(jnp.sum(v1 * v1, axis=(1, 2)))      # weight_norm init: g=||v||
        b1 = 0.01 * jax.random.normal(k1, (cout,), jnp.float32)
        v2 = 0.01 * jax.random.normal(k2, (cout, cout, kernel_size), jnp.float32)
        g2 = jnp.sqrt(jnp.sum(v2 * v2, axis=(1, 2)))
        b2 = 0.01 * jax.random.normal(k3, (cout,), jnp.float32)
        if cin != cout:
            wd = 0.01 * jax.random.normal(k4, (cout, cin, 1), jnp.float32)
            bd = 0.01 * jax.random.normal(k5, (cout,), jnp.float32)
        else:
            wd, bd = None, None
        params.append(dict(v1=v1, g1=g1, b1=b1, v2=v2, g2=g2, b2=b2, wd=wd, bd=bd))
    return params


def temporal_conv_net(x, params, dtype=jnp.float32):
    """TemporalConvNet.forward: sequential fused TemporalBlocks (dropout=0.0)."""
    out = x.astype(dtype)
    for i, p in enumerate(params):
        w1 = apply_weight_norm(p["v1"], p["g1"])
        w2 = apply_weight_norm(p["v2"], p["g2"])
        out = temporal_block(out, w1, p["b1"], w2, p["b2"], p["wd"], p["bd"], 2 ** i)
    return out


# ---------------------------------------------------------------------------
# Pure-JAX reference (lax.conv) for correctness checking
# ---------------------------------------------------------------------------

def _ref_conv1d(x, w, b, dilation, padding):
    y = jax.lax.conv_general_dilated(
        x, w, window_strides=(1,), padding=[(padding, padding)],
        rhs_dilation=(dilation,), dimension_numbers=("NCH", "OIH", "NCH"))
    return y + b.reshape(1, -1, 1)


def _ref_tcn(x, params, kernel_size):
    out = x
    for i, p in enumerate(params):
        dilation = 2 ** i
        pad = (kernel_size - 1) * dilation
        L = out.shape[2]
        w1 = apply_weight_norm(p["v1"], p["g1"])
        w2 = apply_weight_norm(p["v2"], p["g2"])
        h = jnp.maximum(_ref_conv1d(out, w1, p["b1"], dilation, pad)[:, :, :L], 0.0)
        h = jnp.maximum(_ref_conv1d(h, w2, p["b2"], dilation, pad)[:, :, :L], 0.0)
        res = out if p["wd"] is None else _ref_conv1d(out, p["wd"], p["bd"], 1, 0)
        out = jnp.maximum(h + res, 0.0)
    return out


# ---------------------------------------------------------------------------

if __name__ == "__main__":
    key = jax.random.PRNGKey(0)
    kernel_size = 3
    num_channels = [8, 8]

    fwd = jax.jit(temporal_conv_net)

    # Small base case + a sequence length that exercises the lane-aligned
    # time tiling (T=128, multiple tiles with halo handling).
    for batch, num_inputs, seq_len in [(2, 4, 16), (2, 4, 256)]:
        k_x, k_p = jax.random.split(jax.random.fold_in(key, seq_len))
        x = jax.random.normal(k_x, (batch, num_inputs, seq_len), jnp.float32)
        params = init_tcn_params(k_p, num_inputs, num_channels, kernel_size)

        out = jax.block_until_ready(fwd(x, params))
        ref = jax.block_until_ready(_ref_tcn(x, params, kernel_size))
        assert out.shape == (batch, num_channels[-1], seq_len)
        assert jnp.allclose(out, ref, atol=1e-4, rtol=1e-4), (
            "max abs err %e" % float(jnp.max(jnp.abs(out - ref))))

    print("KERNEL_OK")
</pallas_src>

<mosaic_0001>
module attributes {stable_mosaic.version = 11 : i64} {
  func.func @_temporal_block_kernel(%arg0: i32, %arg1: i32, %arg2: memref<1x4x16xf32, #tpu.memory_space<vmem>>, %arg3: memref<8x12xf32, #tpu.memory_space<vmem>>, %arg4: memref<8x1xf32, #tpu.memory_space<vmem>>, %arg5: memref<8x24xf32, #tpu.memory_space<vmem>>, %arg6: memref<8x1xf32, #tpu.memory_space<vmem>>, %arg7: memref<8x4xf32, #tpu.memory_space<vmem>>, %arg8: memref<8x1xf32, #tpu.memory_space<vmem>>, %arg9: memref<1x8x16xf32, #tpu.memory_space<vmem>>, %arg10: memref<4x20xf32, #tpu.memory_space<vmem>>, %arg11: memref<8x18xf32, #tpu.memory_space<vmem>>) attributes {dimension_semantics = [#tpu.dimension_semantics<parallel>, #tpu.dimension_semantics<parallel>], iteration_bounds = array<i64: 2, 1>, scalar_prefetch = 0 : i64, scratch_operands = 2 : i64, tpu.core_type = #tpu.core_type<tc>, window_params = [{transform_indices = @transform_0, window_bounds = array<i64: 1, 4, 16>}, {pipeline_mode = #tpu.pipeline_mode<synchronous>, transform_indices = @transform_1, window_bounds = array<i64: 8, 12>}, {pipeline_mode = #tpu.pipeline_mode<synchronous>, transform_indices = @transform_2, window_bounds = array<i64: 8, 1>}, {pipeline_mode = #tpu.pipeline_mode<synchronous>, transform_indices = @transform_3, window_bounds = array<i64: 8, 24>}, {pipeline_mode = #tpu.pipeline_mode<synchronous>, transform_indices = @transform_4, window_bounds = array<i64: 8, 1>}, {pipeline_mode = #tpu.pipeline_mode<synchronous>, transform_indices = @transform_5, window_bounds = array<i64: 8, 4>}, {pipeline_mode = #tpu.pipeline_mode<synchronous>, transform_indices = @transform_6, window_bounds = array<i64: 8, 1>}, {transform_indices = @transform_7, window_bounds = array<i64: 1, 8, 16>}]} {
    %cst = arith.constant 0.000000e+00 : f32
    %0 = vector.broadcast %cst : f32 to vector<4x4xf32>
    %c0 = arith.constant 0 : index
    %c0_0 = arith.constant 0 : index
    %1 = vector.load %arg10[%c0, %c0_0] : memref<4x20xf32, #tpu.memory_space<vmem>>, vector<4x4xf32>
    tpu.vector_store %arg10[%c0, %c0_0], %0 {strides = array<i32>} : memref<4x20xf32, #tpu.memory_space<vmem>>, vector<4x4xf32>,
    %c0_1 = arith.constant 0 : index
    %c0_2 = arith.constant 0 : index
    %c0_3 = arith.constant 0 : index
    %2 = vector.load %arg2[%c0_1, %c0_2, %c0_3] : memref<1x4x16xf32, #tpu.memory_space<vmem>>, vector<1x4x16xf32>
    %3 = vector.shape_cast %2 : vector<1x4x16xf32> to vector<4x16xf32>
    %c0_4 = arith.constant 0 : index
    %c4 = arith.constant 4 : index
    %4 = vector.load %arg10[%c0_4, %c4] : memref<4x20xf32, #tpu.memory_space<vmem>>, vector<4x16xf32>
    tpu.vector_store %arg10[%c0_4, %c4], %3 {strides = array<i32>} : memref<4x20xf32, #tpu.memory_space<vmem>>, vector<4x16xf32>,
    %c0_5 = arith.constant 0 : index
    %c0_6 = arith.constant 0 : index
    %5 = vector.load %arg10[%c0_5, %c0_6] : memref<4x20xf32, #tpu.memory_space<vmem>>, vector<4x18xf32>
    %c0_7 = arith.constant 0 : index
    %c1 = arith.constant 1 : index
    %6 = vector.load %arg10[%c0_7, %c1] : memref<4x20xf32, #tpu.memory_space<vmem>>, vector<4x18xf32>
    %c0_8 = arith.constant 0 : index
    %c2 = arith.constant 2 : index
    %7 = vector.load %arg10[%c0_8, %c2] : memref<4x20xf32, #tpu.memory_space<vmem>>, vector<4x18xf32>
    %8 = tpu.concatenate %5, %6, %7 in 0 : vector<4x18xf32>, vector<4x18xf32>, vector<4x18xf32> -> vector<12x18xf32>
    %c0_9 = arith.constant 0 : index
    %c0_10 = arith.constant 0 : index
    %9 = vector.load %arg3[%c0_9, %c0_10] : memref<8x12xf32, #tpu.memory_space<vmem>>, vector<8x12xf32>
    %cst_11 = arith.constant dense<0.000000e+00> : vector<8x18xf32>
    %10 = tpu.matmul %9, %8, %cst_11 {dimension_numbers = #tpu.dot_dimension_numbers<[1], [0], [0], [1], [0, 0, 1, 1], [], []>} : vector<8x12xf32>, vector<12x18xf32>, vector<8x18xf32> -> vector<8x18xf32>
    %c0_12 = arith.constant 0 : index
    %c0_13 = arith.constant 0 : index
    %11 = vector.load %arg4[%c0_12, %c0_13] : memref<8x1xf32, #tpu.memory_space<vmem>>, vector<8x1xf32>
    %12 = vector.broadcast %11 : vector<8x1xf32> to vector<8x18xf32>
    %13 = arith.addf %10, %12 : vector<8x18xf32>
    %cst_14 = arith.constant 0.000000e+00 : f32
    %14 = vector.broadcast %cst_14 : f32 to vector<8x18xf32>
    %15 = arith.maximumf %13, %14 : vector<8x18xf32>
    %16 = tpu.iota {dimensions = array<i32: 1>} : vector<8x18xi32>
    %c16_i32 = arith.constant 16 : i32
    %17 = arith.muli %arg1, %c16_i32 : i32
    %18 = vector.broadcast %17 : i32 to vector<8x18xi32>
    %19 = arith.addi %16, %18 : vector<8x18xi32>
    %c2_i32 = arith.constant 2 : i32
    %20 = vector.broadcast %c2_i32 : i32 to vector<8x18xi32>
    %21 = arith.cmpi sge, %19, %20 : vector<8x18xi32>
    %cst_15 = arith.constant 0.000000e+00 : f32
    %22 = vector.broadcast %cst_15 : f32 to vector<8x18xf32>
    %23 = arith.select %21, %15, %22 : vector<8x18xi1>, vector<8x18xf32>
    %c0_16 = arith.constant 0 : index
    %c0_17 = arith.constant 0 : index
    %24 = vector.load %arg11[%c0_16, %c0_17] : memref<8x18xf32, #tpu.memory_space<vmem>>, vector<8x18xf32>
    tpu.vector_store %arg11[%c0_16, %c0_17], %23 {strides = array<i32>} : memref<8x18xf32, #tpu.memory_space<vmem>>, vector<8x18xf32>,
    %c0_18 = arith.constant 0 : index
    %c0_19 = arith.constant 0 : index
    %25 = vector.load %arg11[%c0_18, %c0_19] : memref<8x18xf32, #tpu.memory_space<vmem>>, vector<8x16xf32>
    %c0_20 = arith.constant 0 : index
    %c1_21 = arith.constant 1 : index
    %26 = vector.load %arg11[%c0_20, %c1_21] : memref<8x18xf32, #tpu.memory_space<vmem>>, vector<8x16xf32>
    %c0_22 = arith.constant 0 : index
    %c2_23 = arith.constant 2 : index
    %27 = vector.load %arg11[%c0_22, %c2_23] : memref<8x18xf32, #tpu.memory_space<vmem>>, vector<8x16xf32>
    %28 = tpu.concatenate %25, %26, %27 in 0 : vector<8x16xf32>, vector<8x16xf32>, vector<8x16xf32> -> vector<24x16xf32>
    %c0_24 = arith.constant 0 : index
    %c0_25 = arith.constant 0 : index
    %29 = vector.load %arg5[%c0_24, %c0_25] : memref<8x24xf32, #tpu.memory_space<vmem>>, vector<8x24xf32>
    %cst_26 = arith.constant dense<0.000000e+00> : vector<8x16xf32>
    %30 = tpu.matmul %29, %28, %cst_26 {dimension_numbers = #tpu.dot_dimension_numbers<[1], [0], [0], [1], [0, 0, 1, 1], [], []>} : vector<8x24xf32>, vector<24x16xf32>, vector<8x16xf32> -> vector<8x16xf32>
    %c0_27 = arith.constant 0 : index
    %c0_28 = arith.constant 0 : index
    %31 = vector.load %arg6[%c0_27, %c0_28] : memref<8x1xf32, #tpu.memory_space<vmem>>, vector<8x1xf32>
    %32 = vector.broadcast %31 : vector<8x1xf32> to vector<8x16xf32>
    %33 = arith.addf %30, %32 : vector<8x16xf32>
    %cst_29 = arith.constant 0.000000e+00 : f32
    %34 = vector.broadcast %cst_29 : f32 to vector<8x16xf32>
    %35 = arith.maximumf %33, %34 : vector<8x16xf32>
    %c0_30 = arith.constant 0 : index
    %c4_31 = arith.constant 4 : index
    %36 = vector.load %arg10[%c0_30, %c4_31] : memref<4x20xf32, #tpu.memory_space<vmem>>, vector<4x16xf32>
    %c0_32 = arith.constant 0 : index
    %c0_33 = arith.constant 0 : index
    %37 = vector.load %arg7[%c0_32, %c0_33] : memref<8x4xf32, #tpu.memory_space<vmem>>, vector<8x4xf32>
    %cst_34 = arith.constant dense<0.000000e+00> : vector<8x16xf32>
    %38 = tpu.matmul %37, %36, %cst_34 {dimension_numbers = #tpu.dot_dimension_numbers<[1], [0], [0], [1], [0, 0, 1, 1], [], []>} : vector<8x4xf32>, vector<4x16xf32>, vector<8x16xf32> -> vector<8x16xf32>
    %c0_35 = arith.constant 0 : index
    %c0_36 = arith.constant 0 : index
    %39 = vector.load %arg8[%c0_35, %c0_36] : memref<8x1xf32, #tpu.memory_space<vmem>>, vector<8x1xf32>
    %40 = vector.broadcast %39 : vector<8x1xf32> to vector<8x16xf32>
    %41 = arith.addf %38, %40 : vector<8x16xf32>
    %42 = arith.addf %35, %41 : vector<8x16xf32>
    %cst_37 = arith.constant 0.000000e+00 : f32
    %43 = vector.broadcast %cst_37 : f32 to vector<8x16xf32>
    %44 = arith.maximumf %42, %43 : vector<8x16xf32>
    %c0_38 = arith.constant 0 : index
    %c0_39 = arith.constant 0 : index
    %c0_40 = arith.constant 0 : index
    %45 = vector.load %arg9[%c0_38, %c0_39, %c0_40] : memref<1x8x16xf32, #tpu.memory_space<vmem>>, vector<1x8x16xf32>
    %46 = vector.shape_cast %45 : vector<1x8x16xf32> to vector<8x16xf32>
    %47 = vector.shape_cast %44 : vector<8x16xf32> to vector<1x8x16xf32>
    tpu.vector_store %arg9[%c0_38, %c0_39, %c0_40], %47 {strides = array<i32>} : memref<1x8x16xf32, #tpu.memory_space<vmem>>, vector<1x8x16xf32>,
    return
  }
  func.func @transform_0(%arg0: i32, %arg1: i32) -> (i32, i32, i32) {
    %c0_i32 = arith.constant 0 : i32
    %c0_i32_0 = arith.constant 0 : i32
    %c0_i32_1 = arith.constant 0 : i32
    return %arg0, %c0_i32, %c0_i32_0 : i32, i32, i32
  }
  func.func @transform_1(%arg0: i32, %arg1: i32) -> (i32, i32) {
    %c0_i32 = arith.constant 0 : i32
    %c0_i32_0 = arith.constant 0 : i32
    %c0_i32_1 = arith.constant 0 : i32
    return %c0_i32, %c0_i32_0 : i32, i32
  }
  func.func @transform_2(%arg0: i32, %arg1: i32) -> (i32, i32) {
    %c0_i32 = arith.constant 0 : i32
    %c0_i32_0 = arith.constant 0 : i32
    %c0_i32_1 = arith.constant 0 : i32
    return %c0_i32, %c0_i32_0 : i32, i32
  }
  func.func @transform_3(%arg0: i32, %arg1: i32) -> (i32, i32) {
    %c0_i32 = arith.constant 0 : i32
    %c0_i32_0 = arith.constant 0 : i32
    %c0_i32_1 = arith.constant 0 : i32
    return %c0_i32, %c0_i32_0 : i32, i32
  }
  func.func @transform_4(%arg0: i32, %arg1: i32) -> (i32, i32) {
    %c0_i32 = arith.constant 0 : i32
    %c0_i32_0 = arith.constant 0 : i32
    %c0_i32_1 = arith.constant 0 : i32
    return %c0_i32, %c0_i32_0 : i32, i32
  }
  func.func @transform_5(%arg0: i32, %arg1: i32) -> (i32, i32) {
    %c0_i32 = arith.constant 0 : i32
    %c0_i32_0 = arith.constant 0 : i32
    %c0_i32_1 = arith.constant 0 : i32
    return %c0_i32, %c0_i32_0 : i32, i32
  }
  func.func @transform_6(%arg0: i32, %arg1: i32) -> (i32, i32) {
    %c0_i32 = arith.constant 0 : i32
    %c0_i32_0 = arith.constant 0 : i32
    %c0_i32_1 = arith.constant 0 : i32
    return %c0_i32, %c0_i32_0 : i32, i32
  }
  func.func @transform_7(%arg0: i32, %arg1: i32) -> (i32, i32, i32) {
    %c0_i32 = arith.constant 0 : i32
    %c0_i32_0 = arith.constant 0 : i32
    return %arg0, %c0_i32, %arg1 : i32, i32, i32
  }
}

module attributes {stable_mosaic.version = 11 : i64} {
  func.func @_temporal_block_kernel(%arg0: i32, %arg1: i32, %arg2: memref<1x8x16xf32, #tpu.memory_space<vmem>>, %arg3: memref<8x24xf32, #tpu.memory_space<vmem>>, %arg4: memref<8x1xf32, #tpu.memory_space<vmem>>, %arg5: memref<8x24xf32, #tpu.memory_space<vmem>>, %arg6: memref<8x1xf32, #tpu.memory_space<vmem>>, %arg7: memref<1x8x16xf32, #tpu.memory_space<vmem>>, %arg8: memref<8x24xf32, #tpu.memory_space<vmem>>, %arg9: memref<8x20xf32, #tpu.memory_space<vmem>>) attributes {dimension_semantics = [#tpu.dimension_semantics<parallel>, #tpu.dimension_semantics<parallel>], iteration_bounds = array<i64: 2, 1>, scalar_prefetch = 0 : i64, scratch_operands = 2 : i64, tpu.core_type = #tpu.core_type<tc>, window_params = [{transform_indices = @transform_0, window_bounds = array<i64: 1, 8, 16>}, {pipeline_mode = #tpu.pipeline_mode<synchronous>, transform_indices = @transform_1, window_bounds = array<i64: 8, 24>}, {pipeline_mode = #tpu.pipeline_mode<synchronous>, transform_indices = @transform_2, window_bounds = array<i64: 8, 1>}, {pipeline_mode = #tpu.pipeline_mode<synchronous>, transform_indices = @transform_3, window_bounds = array<i64: 8, 24>}, {pipeline_mode = #tpu.pipeline_mode<synchronous>, transform_indices = @transform_4, window_bounds = array<i64: 8, 1>}, {transform_indices = @transform_5, window_bounds = array<i64: 1, 8, 16>}]} {
    %cst = arith.constant 0.000000e+00 : f32
    %0 = vector.broadcast %cst : f32 to vector<8x8xf32>
    %c0 = arith.constant 0 : index
    %c0_0 = arith.constant 0 : index
    %1 = vector.load %arg8[%c0, %c0_0] : memref<8x24xf32, #tpu.memory_space<vmem>>, vector<8x8xf32>
    tpu.vector_store %arg8[%c0, %c0_0], %0 {strides = array<i32>} : memref<8x24xf32, #tpu.memory_space<vmem>>, vector<8x8xf32>,
    %c0_1 = arith.constant 0 : index
    %c0_2 = arith.constant 0 : index
    %c0_3 = arith.constant 0 : index
    %2 = vector.load %arg2[%c0_1, %c0_2, %c0_3] : memref<1x8x16xf32, #tpu.memory_space<vmem>>, vector<1x8x16xf32>
    %3 = vector.shape_cast %2 : vector<1x8x16xf32> to vector<8x16xf32>
    %c0_4 = arith.constant 0 : index
    %c8 = arith.constant 8 : index
    %4 = vector.load %arg8[%c0_4, %c8] : memref<8x24xf32, #tpu.memory_space<vmem>>, vector<8x16xf32>
    tpu.vector_store %arg8[%c0_4, %c8], %3 {strides = array<i32>} : memref<8x24xf32, #tpu.memory_space<vmem>>, vector<8x16xf32>,
    %c0_5 = arith.constant 0 : index
    %c0_6 = arith.constant 0 : index
    %5 = vector.load %arg8[%c0_5, %c0_6] : memref<8x24xf32, #tpu.memory_space<vmem>>, vector<8x20xf32>
    %c0_7 = arith.constant 0 : index
    %c2 = arith.constant 2 : index
    %6 = vector.load %arg8[%c0_7, %c2] : memref<8x24xf32, #tpu.memory_space<vmem>>, vector<8x20xf32>
    %c0_8 = arith.constant 0 : index
    %c4 = arith.constant 4 : index
    %7 = vector.load %arg8[%c0_8, %c4] : memref<8x24xf32, #tpu.memory_space<vmem>>, vector<8x20xf32>
    %8 = tpu.concatenate %5, %6, %7 in 0 : vector<8x20xf32>, vector<8x20xf32>, vector<8x20xf32> -> vector<24x20xf32>
    %c0_9 = arith.constant 0 : index
    %c0_10 = arith.constant 0 : index
    %9 = vector.load %arg3[%c0_9, %c0_10] : memref<8x24xf32, #tpu.memory_space<vmem>>, vector<8x24xf32>
    %cst_11 = arith.constant dense<0.000000e+00> : vector<8x20xf32>
    %10 = tpu.matmul %9, %8, %cst_11 {dimension_numbers = #tpu.dot_dimension_numbers<[1], [0], [0], [1], [0, 0, 1, 1], [], []>} : vector<8x24xf32>, vector<24x20xf32>, vector<8x20xf32> -> vector<8x20xf32>
    %c0_12 = arith.constant 0 : index
    %c0_13 = arith.constant 0 : index
    %11 = vector.load %arg4[%c0_12, %c0_13] : memref<8x1xf32, #tpu.memory_space<vmem>>, vector<8x1xf32>
    %12 = vector.broadcast %11 : vector<8x1xf32> to vector<8x20xf32>
    %13 = arith.addf %10, %12 : vector<8x20xf32>
    %cst_14 = arith.constant 0.000000e+00 : f32
    %14 = vector.broadcast %cst_14 : f32 to vector<8x20xf32>
    %15 = arith.maximumf %13, %14 : vector<8x20xf32>
    %16 = tpu.iota {dimensions = array<i32: 1>} : vector<8x20xi32>
    %c16_i32 = arith.constant 16 : i32
    %17 = arith.muli %arg1, %c16_i32 : i32
    %18 = vector.broadcast %17 : i32 to vector<8x20xi32>
    %19 = arith.addi %16, %18 : vector<8x20xi32>
    %c4_i32 = arith.constant 4 : i32
    %20 = vector.broadcast %c4_i32 : i32 to vector<8x20xi32>
    %21 = arith.cmpi sge, %19, %20 : vector<8x20xi32>
    %cst_15 = arith.constant 0.000000e+00 : f32
    %22 = vector.broadcast %cst_15 : f32 to vector<8x20xf32>
    %23 = arith.select %21, %15, %22 : vector<8x20xi1>, vector<8x20xf32>
    %c0_16 = arith.constant 0 : index
    %c0_17 = arith.constant 0 : index
    %24 = vector.load %arg9[%c0_16, %c0_17] : memref<8x20xf32, #tpu.memory_space<vmem>>, vector<8x20xf32>
    tpu.vector_store %arg9[%c0_16, %c0_17], %23 {strides = array<i32>} : memref<8x20xf32, #tpu.memory_space<vmem>>, vector<8x20xf32>,
    %c0_18 = arith.constant 0 : index
    %c0_19 = arith.constant 0 : index
    %25 = vector.load %arg9[%c0_18, %c0_19] : memref<8x20xf32, #tpu.memory_space<vmem>>, vector<8x16xf32>
    %c0_20 = arith.constant 0 : index
    %c2_21 = arith.constant 2 : index
    %26 = vector.load %arg9[%c0_20, %c2_21] : memref<8x20xf32, #tpu.memory_space<vmem>>, vector<8x16xf32>
    %c0_22 = arith.constant 0 : index
    %c4_23 = arith.constant 4 : index
    %27 = vector.load %arg9[%c0_22, %c4_23] : memref<8x20xf32, #tpu.memory_space<vmem>>, vector<8x16xf32>
    %28 = tpu.concatenate %25, %26, %27 in 0 : vector<8x16xf32>, vector<8x16xf32>, vector<8x16xf32> -> vector<24x16xf32>
    %c0_24 = arith.constant 0 : index
    %c0_25 = arith.constant 0 : index
    %29 = vector.load %arg5[%c0_24, %c0_25] : memref<8x24xf32, #tpu.memory_space<vmem>>, vector<8x24xf32>
    %cst_26 = arith.constant dense<0.000000e+00> : vector<8x16xf32>
    %30 = tpu.matmul %29, %28, %cst_26 {dimension_numbers = #tpu.dot_dimension_numbers<[1], [0], [0], [1], [0, 0, 1, 1], [], []>} : vector<8x24xf32>, vector<24x16xf32>, vector<8x16xf32> -> vector<8x16xf32>
    %c0_27 = arith.constant 0 : index
    %c0_28 = arith.constant 0 : index
    %31 = vector.load %arg6[%c0_27, %c0_28] : memref<8x1xf32, #tpu.memory_space<vmem>>, vector<8x1xf32>
    %32 = vector.broadcast %31 : vector<8x1xf32> to vector<8x16xf32>
    %33 = arith.addf %30, %32 : vector<8x16xf32>
    %cst_29 = arith.constant 0.000000e+00 : f32
    %34 = vector.broadcast %cst_29 : f32 to vector<8x16xf32>
    %35 = arith.maximumf %33, %34 : vector<8x16xf32>
    %c0_30 = arith.constant 0 : index
    %c8_31 = arith.constant 8 : index
    %36 = vector.load %arg8[%c0_30, %c8_31] : memref<8x24xf32, #tpu.memory_space<vmem>>, vector<8x16xf32>
    %37 = arith.addf %35, %36 : vector<8x16xf32>
    %cst_32 = arith.constant 0.000000e+00 : f32
    %38 = vector.broadcast %cst_32 : f32 to vector<8x16xf32>
    %39 = arith.maximumf %37, %38 : vector<8x16xf32>
    %c0_33 = arith.constant 0 : index
    %c0_34 = arith.constant 0 : index
    %c0_35 = arith.constant 0 : index
    %40 = vector.load %arg7[%c0_33, %c0_34, %c0_35] : memref<1x8x16xf32, #tpu.memory_space<vmem>>, vector<1x8x16xf32>
    %41 = vector.shape_cast %40 : vector<1x8x16xf32> to vector<8x16xf32>
    %42 = vector.shape_cast %39 : vector<8x16xf32> to vector<1x8x16xf32>
    tpu.vector_store %arg7[%c0_33, %c0_34, %c0_35], %42 {strides = array<i32>} : memref<1x8x16xf32, #tpu.memory_space<vmem>>, vector<1x8x16xf32>,
    return
  }
  func.func @transform_0(%arg0: i32, %arg1: i32) -> (i32, i32, i32) {
    %c0_i32 = arith.constant 0 : i32
    %c0_i32_0 = arith.constant 0 : i32
    %c0_i32_1 = arith.constant 0 : i32
    return %arg0, %c0_i32, %c0_i32_0 : i32, i32, i32
  }
  func.func @transform_1(%arg0: i32, %arg1: i32) -> (i32, i32) {
    %c0_i32 = arith.constant 0 : i32
    %c0_i32_0 = arith.constant 0 : i32
    %c0_i32_1 = arith.constant 0 : i32
    return %c0_i32, %c0_i32_0 : i32, i32
  }
  func.func @transform_2(%arg0: i32, %arg1: i32) -> (i32, i32) {
    %c0_i32 = arith.constant 0 : i32
    %c0_i32_0 = arith.constant 0 : i32
    %c0_i32_1 = arith.constant 0 : i32
    return %c0_i32, %c0_i32_0 : i32, i32
  }
  func.func @transform_3(%arg0: i32, %arg1: i32) -> (i32, i32) {
    %c0_i32 = arith.constant 0 : i32
    %c0_i32_0 = arith.constant 0 : i32
    %c0_i32_1 = arith.constant 0 : i32
    return %c0_i32, %c0_i32_0 : i32, i32
  }
  func.func @transform_4(%arg0: i32, %arg1: i32) -> (i32, i32) {
    %c0_i32 = arith.constant 0 : i32
    %c0_i32_0 = arith.constant 0 : i32
    %c0_i32_1 = arith.constant 0 : i32
    return %c0_i32, %c0_i32_0 : i32, i32
  }
  func.func @transform_5(%arg0: i32, %arg1: i32) -> (i32, i32, i32) {
    %c0_i32 = arith.constant 0 : i32
    %c0_i32_0 = arith.constant 0 : i32
    return %arg0, %c0_i32, %arg1 : i32, i32, i32
  }
}

</mosaic_0001>

<bundles_post_ra>
// kernel: temporal_conv_net.3
= control target key start
LH: loop header
LB: loop body
LE: loop exit
PB: predicated region body
PF: predicated region fallthrough
CT: control target
= control target key end

     0   :  { %10 = vsyncpa [#allocation5], 0  ;;  %s728_s0 = inlined_call_operand.vmem [shape: f32[2,8,16], index: 0, kind: input, shape index: {}]   ;;  %s729_s1 = inlined_call_operand.vmem [shape: f32[8,24], index: 1, kind: input, shape index: {}]   ;;  %s730_s2 = inlined_call_operand.vmem [shape: f32[8,1], index: 2, kind: input, shape index: {}]   ;;  %s731_s3 = inlined_call_operand.vmem [shape: f32[8,24], index: 3, kind: input, shape index: {}]   ;;  %s732_s4 = inlined_call_operand.vmem [shape: f32[8,1], index: 4, kind: input, shape index: {}]   ;;  %s733_s5 = inlined_call_operand.hbm [shape: f32[2,8,16], index: 5, kind: output, shape index: {}]  }
   0x1   :  { %12 = vsyncpa [#allocation5 + $0x1], 0  ;;  %s617_s18 = smov 0   ;;  %s619_s19 = smov 0  }
   0x2   :  { %s621_s20 = smov 0   ;;  %s623_s21 = smov 0  }
   0x3   :  { %s625_s22 = smov 0   ;;  %s627_s23 = smov 0  }
   0x4 LB: > { %s425_s24 = sadd.s32 4294967295, %s579_s23   ;;  %s426_s25 = sadd.s32 4294967294, %s579_s23   ;;  %s579_s23 = sphi %s627_s23, %s18_s23   ;;  %s575_s22 = sphi %s625_s22, %s740_s22   ;;  %s571_s21 = sphi %s623_s21, %s739_s21   ;;  %s567_s20 = sphi %s621_s20, %s738_s20   ;;  %s563_s19 = sphi %s619_s19, %s737_s19   ;;  %s559_s18 = sphi %s617_s18, %s736_s18  }
   0x5   : > { %s30_s26 = sadd.s32 1, %s575_s22  ;;  %s149_s27 = sadd.s32 1, %s567_s20 }
   0x6   : > { %p32_p0 = scmp.ge.s32.totalorder %s30_s26, 2  ;;  %p159_p1 = scmp.ne.s32.totalorder %s567_s20, %s563_s19 }
   0x7   : > { %p160_p2 = scmp.eq.s32.totalorder %s425_s24, 1  ;;  %p165_p3 = scmp.ne.s32.totalorder %s563_s19, %s559_s18 }
   0x8   : > { %s742_s26 = smov (%p32_p0, %s30_s26), 0  ;;  %p166_p5 = scmp.eq.s32.totalorder %s426_s25, 1 }
   0x9   : > { %p657_p4 = por %p160_p2, %p159_p1  ;;  %s144_s29 = ssub.s32 %s575_s22, %s742_s26 }
   0xa   : > { %p429_p6 = scmp.ge.s32.totalorder %s579_s23, 1  ;;  %p147_p7 = scmp.eq.s32.totalorder %s144_s29, 0 }
   0xb   : > { %p664_p8 = por %p166_p5, %p165_p3  ;;  %p203_p9 = scmp.lt.s32.totalorder %s579_s23, 3 }
   0xc   : > { %s670_s6 = scalar_select %p147_p7, %s567_s20, %s149_s27  }
   0xd   : > { %p204_p10 = pnand %p429_p6, %p203_p9 }
   0xe   : > { %p230_p11 = scmp.lt.s32.totalorder (!%p204_p10), %s571_s21, 1  ;;  %s582_s12 = smov (!%p204_p10), 8  }
   0xf   : > { %207 = sbr.rel (%p204_p10) target bundleno = 646 (0x286), region = 40  ;;  %s584_s13 = smov (!%p204_p10), 126  }
  0x10   : > { %s585_s14 = smov (!%p204_p10), 124   ;;  %s586_s17 = smov (!%p204_p10), 120  }
  0x11   : > { %s227_s9 = sand.u32 (!%p204_p10), 1, %s563_s19  }
  0x12   : > { %s430_s10 = sshll.u32 (!%p204_p10), %s227_s9, 3  ;;  %s341_s24 = scalar_lea.sflag (!%p204_p10), [#allocation5], %s227_s9 }
  0x13   : > { %s229_s15 = scalar_lea.vmem (!%p204_p10), [#allocation4], %s430_s10 }
  0x14   : > { %vm234_vm0 = vcmask 64512   ;;  %v581_v0 = vmov 0.0   ;;  %s231_s7 = scalar_select %p230_p11, %s571_s21, 1  ;;  %v583_v2 = vmov 0   ;;  %vm241_vm1 = vcmask 195648   ;;  %v252_v5 = vld [vmem:[%s730_s2] sm:$0xff] }
  0x15   : > { %235 = vst.msk [vmem:[#allocation2] sm:$0xff] %vm234_vm0, %v581_v0  ;;  %499 = vset.pattern.permute.xlu1 %v583_v2  ;;  %500 = vset.pattern.permute.xlu0 %v583_v2  ;;  %v251_v8 = vld [vmem:[%s729_s1] sm:$0xff]  ;;  %vm258_vm2 = vcmask 195584   ;;  %v283_v9 = vlaneseq  ;;  %vm290_vm4 = vcmask 162816   ;;  %s354_s16 = sshll.u32 %s229_s15, 4  ;;  %vm338_vm5 = vcmask 130048   ;;  %s355_s16 = int_to_ptr.vmem [resolvable:$true] %s354_s16 }
  0x16   : > { %s431_s8 = sshll.u32 %s231_s7, 3  ;;  %v301_v17 = vld [vmem:[%s732_s4] sm:$0xff]  ;;  %s521_s7 = scalar_lea.hbm %s733_s5, 16 }
  0x17   : > { %s233_s11 = scalar_lea.vmem %s728_s0, %s431_s8  ;;  %v284_v10 = vand.u32 127, %v283_v9  ;;  %v300_v20 = vld [vmem:[%s731_s3] sm:$0xff] }
  0x18   : > { %v236_v1 = vld [vmem:[%s233_s11] sm:$0xff]  ;;  %s435_s11 = sshll.u32 %s571_s21, 3 }
  0x19   : > { %238 = vrot.lane.b32.xlu0 %v236_v1, %s582_s12  ;;  %vm288_vm3 = vcmp.ge.s32.totalorder %v284_v10, 4 }
  0x8b   : > { %v239_v3 = vpop.permute.xlu0 %238 }
  0x8c   : > { %242 = vst.msk [vmem:[#allocation2] sm:$0xff] %vm241_vm1, %v239_v3 }
  0x93   : > { %v243_v4 = vld [vmem:[#allocation2] sm:$0xff] }
  0x94   : > { %245 = vrot.lane.b32.xlu1 %v243_v4, %s584_s13  ;;  %248 = vrot.lane.b32.xlu0 %v243_v4, %s585_s14 }
  0x9c   : > { %255 = vperm.xlu1 %499, %v252_v5   ;;  %304 = vperm.xlu0 %500, %v301_v17  }
  0xa4   : > { %333 = vrot.lane.b32.xlu1 %v243_v4, %s586_s17 }
 0x106   : > { %v249_v6 = vpop.permute.xlu0 %248  ;;  %v246_v7 = vpop.permute.xlu1 %245 }
 0x107   : > { %275 = vmatpush.msra.mxu0 %v249_v6 }
 0x109   : > { %276 = vmatpush.msra.mxu0 %v246_v7 }
 0x10b   : > { %277 = vmatpush.msra.mxu0 %v243_v4 }
 0x10c   : > { %432 = vmatmul.msk.f32.vlgmr.msra.gmra.mxu0 %vm258_vm2, %v251_v8 }
 0x10e   : > { %v256_v11 = vpop.permute.xlu1 %255  ;;  %v305_v21 = vpop.permute.xlu0 %304 }
 0x116   : > { %v334_v25 = vpop.permute.xlu1 %333 }
 0x189   : > { %v279_v12 = vpop.f32.mrf.mxu0 }
 0x18a   : > { %v280_v13 = vadd.f32 %v279_v12, %v256_v11 }
 0x18c   : > { %v282_v14 = vmax.f32 %v280_v13, 0.0 }
 0x18e   : > { %v289_v15 = vsel %vm288_vm3, %v282_v14, 0.0 }
 0x18f   : > { %291 = vst.msk [vmem:[#allocation3] sm:$0xff] %vm290_vm4, %v289_v15 }
 0x196   : > { %v292_v16 = vld [vmem:[#allocation3] sm:$0xff] }
 0x197   : > { %297 = vrot.lane.b32.xlu2 %v292_v16, %s585_s14  ;;  %s352_s14 = scalar_lea.hbm %s733_s5, %s435_s11 }
 0x198   : > { %s356_s17 = sshll.u32 %s352_s14, 4  ;;  %s357_s17 = int_to_ptr.hbm [resolvable:$true] %s356_s17 }
 0x199   : > { %s515_s21 = sshra.s32 %s357_s17, 4  ;;  %s516_s21 = int_to_ptr.hbm [resolvable:$true] %s515_s21 }
 0x19a   : > { %s517_s25 = scalar_lea.hbm %s516_s21, 8  ;;  %p522_p1 = scmp.lt.s32.totalorder %s516_s21, %s733_s5 }
 0x19b   : > { %p518_p12 = scmp.ne.s32.totalorder %s516_s21, %s517_s25  ;;  %p523_p2 = scmp.lt.s32.totalorder %s521_s7, %s517_s25 }
 0x19d   : > { %p519_p13 = pnand %p518_p12, %p657_p4  ;;  %p524_p3 = por %p523_p2, %p522_p1 }
 0x19f   : > { %294 = vrot.lane.b32.xlu2 %v292_v16, %s584_s13  ;;  %p520_p0 = pneg %p519_p13 }
 0x1a1   : > { %p525_p5 = pnand %p524_p3, %p520_p0 }
 0x1f1   : > { %v298_v18 = vpop.permute.xlu2 %297 }
 0x1f2   : > { %323 = vmatpush.msra.mxu1 %v298_v18 }
 0x1f9   : > { %v295_v19 = vpop.permute.xlu2 %294 }
 0x1fa   : > { %324 = vmatpush.msra.mxu1 %v295_v19 }
 0x1fc   : > { %325 = vmatpush.msra.mxu1 %v292_v16 }
 0x1fd   : > { %433 = vmatmul.msk.f32.vlgmr.msra.gmra.mxu1 %vm258_vm2, %v300_v20 }
 0x27a   : > { %v327_v22 = vpop.f32.mrf.mxu1 }
 0x27b   : > { %v328_v23 = vadd.f32 %v327_v22, %v305_v21 }
 0x27d   : > { %v330_v24 = vmax.f32 %v328_v23, 0.0 }
 0x27f   : > { %v336_v26 = vadd.f32 %v334_v25, %v330_v24 }
 0x281   : > { %v337_v27 = vmax.f32 %v336_v26, 0.0 }
 0x283   : > { %339 = vst.msk [vmem:[%s229_s15] sm:$0xff] %vm338_vm5, %v337_v27 }
 0x284   : > { %528 = shalt.err (!%p525_p5)
}
 0x285   : > { %438 = dma.vmem_to_hbm [thread:$0]  (%p657_p4), %s355_s16, 128, %s357_s17, %s341_s24  }
 0x286 PF: > { %p444_p6 = scmp.ge.s32.totalorder %s579_s23, 2  ;;  %s368_s9 = sand.u32 1, %s559_s18  }
 0x287   : > { %s369_s11 = scalar_lea.sflag [#allocation5], %s368_s9 }
 0x288   : > { %p441_p7 = pnand %p444_p6, %p664_p8 }
 0x28a   : > { %p442_p9 = pneg %p441_p7 }
 0x28c   : > { %554 = dma.done.wait (%p442_p9), %s369_s11, 128  }
 0x28d   : > { %556 = vsyncadd (%p442_p9), %s369_s11, 4294967168  ;;  %s18_s23 = sadd.s32 1, %s579_s23   ;;  %s736_s18 = smov %s563_s19 }
 0x28e   : > { %p15_p10 = scmp.ge.s32.totalorder %s18_s23, 4   ;;  %s737_s19 = smov %s567_s20 }
 0x28f   : > { %s738_s20 = smov %s670_s6  ;;  %s739_s21 = smov %s575_s22 }
 0x290   : > { %s740_s22 = smov %s742_s26  ;;  %17 = sbr.rel (!%p15_p10) target bundleno = 4 (0x4), region = 75 }
 0x295   :  { %375 = vsyncpa [#allocation5], 1 }
 0x296   :  { %377 = vsyncpa [#allocation5 + $0x1], 1 }

// kernel: temporal_conv_net.2
= control target key start
LH: loop header
LB: loop body
LE: loop exit
PB: predicated region body
PF: predicated region fallthrough
CT: control target
= control target key end

     0   :  { %s625_s24 = smov 0   ;;  %s627_s25 = smov 0   ;;  %s685_s0 = inlined_call_operand.vmem [shape: f32[2,4,16], index: 0, kind: input, shape index: {}]   ;;  %s686_s1 = inlined_call_operand.vmem [shape: f32[8,12], index: 1, kind: input, shape index: {}]   ;;  %s687_s2 = inlined_call_operand.vmem [shape: f32[8,1], index: 2, kind: input, shape index: {}]   ;;  %s688_s3 = inlined_call_operand.vmem [shape: f32[8,24], index: 3, kind: input, shape index: {}]   ;;  %s689_s4 = inlined_call_operand.vmem [shape: f32[8,1], index: 4, kind: input, shape index: {}]   ;;  %s690_s5 = inlined_call_operand.vmem [shape: f32[8,4], index: 5, kind: input, shape index: {}]   ;;  %s691_s6 = inlined_call_operand.vmem [shape: f32[8,1], index: 6, kind: input, shape index: {}]   ;;  %s692_s7 = inlined_call_operand.vmem [shape: f32[2,8,16], index: 7, kind: output, shape index: {}]  }
   0x1   :  { %s629_s26 = smov 0  }
   0x2 LB: > { %s29_s27 = sadd.s32 1, %s573_s25  ;;  %p512_p0 = scmp.ge.s32.totalorder %s577_s26, 1  ;;  %s577_s26 = sphi %s629_s26, %s17_s26   ;;  %s573_s25 = sphi %s627_s25, %s694_s25   ;;  %s569_s24 = sphi %s625_s24, %s693_s24  }
   0x3   : > { %p31_p1 = scmp.ge.s32.totalorder %s29_s27, 2  ;;  %p250_p2 = scmp.lt.s32.totalorder %s577_s26, 3 }
   0x5   : > { %s696_s27 = smov (%p31_p1, %s29_s27), 0  ;;  %p251_p3 = pnand %p512_p0, %p250_p2 }
   0x6   : > { %p283_p4 = scmp.lt.s32.totalorder (!%p251_p3), %s569_s24, 1  ;;  %s580_s9 = smov (!%p251_p3), 4  }
   0x7   : > { %254 = sbr.rel (%p251_p3) target bundleno = 650 (0x28a), region = 48  ;;  %s581_s10 = smov (!%p251_p3), 126  }
   0x8   : > { %s582_s11 = smov (!%p251_p3), 127   ;;  %s584_s18 = smov (!%p251_p3), 124  }
   0xc   : > { %vm294_vm0 = vcmask 27648   ;;  %v579_v0 = vmov 0.0   ;;  %s698_s24 = smov (!%p283_p4, %s569_s24), 1  ;;  %vm301_vm1 = vcmask 158752   ;;  %v314_v5 = vld [vmem:[%s687_s2] sm:$0xff]  ;;  %v583_v6 = vmov 0  }
   0xd   : > { %295 = vst.msk [vmem:[#allocation2] sm:$0xf] %vm294_vm0, %v579_v0  ;;  %s513_s28 = sshll.u32 %s698_s24, 2  ;;  %552 = vset.pattern.permute.xlu1 %v583_v6  ;;  %553 = vset.pattern.permute.xlu2 %v583_v6  ;;  %v365_v7 = vld [vmem:[%s689_s4] sm:$0xff]  ;;  %vm311_vm2 = vcmask 1043456   ;;  %vm320_vm3 = vcmask 97280   ;;  %v347_v12 = vlaneseq }
   0xe   : > { %s286_s8 = scalar_lea.vmem %s685_s0, %s513_s28  ;;  %554 = vset.pattern.permute.xlu0 %v583_v6  ;;  %v313_v10 = vld [vmem:[%s686_s1] sm:$0xff]  ;;  %vm354_vm5 = vcmask 146432   ;;  %vm407_vm6 = vcmask 31744   ;;  %vm371_vm7 = vcmask 195584   ;;  %s514_s29 = sshll.u32 %s698_s24, 3  ;;  %vm435_vm8 = vcmask 130048  }
   0xf   : > { %v296_v1 = vld [vmem:[%s286_s8] sm:$0xf]  ;;  %v348_v13 = vand.u32 127, %v347_v12 }
  0x10   : > { %298 = vrot.lane.b32.xlu0 %v296_v1, %s580_s9  ;;  %v398_v21 = vld [vmem:[%s691_s6] sm:$0xff]  ;;  %s293_s9 = scalar_lea.vmem %s692_s7, %s514_s29 }
  0x11   : > { %vm352_vm4 = vcmp.ge.s32.totalorder %v348_v13, 2  ;;  %v397_v23 = vld [vmem:[%s690_s5] sm:$0xff] }
  0x12   : > { %v364_v26 = vld [vmem:[%s688_s3] sm:$0xff] }
  0x82   : > { %v299_v2 = vpop.permute.xlu0 %298 }
  0x83   : > { %302 = vst.msk [vmem:[#allocation2] sm:$0xf] %vm301_vm1, %v299_v2 }
  0x8a   : > { %v303_v3 = vld [vmem:[#allocation2] sm:$0xf] }
  0x8b   : > { %309 = vrot.lane.b32.xlu0 %v303_v3, %s581_s10  ;;  %v305_v4 = vrot.slane %v303_v3, 4  ;;  %v396_v20 = vld [vmem:[#allocation2] sm:$0xf] }
  0x8d   : > { %306 = vrot.lane.b32.xlu1 %v305_v4, %s582_s11 }
  0x95   : > { %317 = vperm.xlu1 %552, %v314_v5  }
  0x9d   : > { %368 = vperm.xlu1 %552, %v365_v7  }
  0xfd   : > { %v310_v8 = vpop.permute.xlu0 %309 }
  0xfe   : > { %515 = vmatpush.msk.msra.mxu0 %vm311_vm2, %v310_v8 }
  0xff   : > { %v307_v9 = vpop.permute.xlu1 %306 }
 0x100   : > { %v312_v11 = vsel %vm311_vm2, %v303_v3, %v307_v9 }
 0x101   : > { %341 = vmatpush.msra.mxu0 %v312_v11 }
 0x102   : > { %516 = vmatmul.msk.f32.vlgmr.msra.gmra.mxu0 %vm320_vm3, %v313_v10 }
 0x107   : > { %v318_v14 = vpop.permute.xlu1 %317 }
 0x10f   : > { %v369_v29 = vpop.permute.xlu1 %368 }
 0x17f   : > { %v343_v15 = vpop.f32.mrf.mxu0 }
 0x180   : > { %v344_v16 = vadd.f32 %v343_v15, %v318_v14 }
 0x182   : > { %v346_v17 = vmax.f32 %v344_v16, 0.0 }
 0x184   : > { %v353_v18 = vsel %vm352_vm4, %v346_v17, 0.0 }
 0x185   : > { %355 = vst.msk [vmem:[#allocation3] sm:$0xff] %vm354_vm5, %v353_v18 }
 0x18c   : > { %v356_v19 = vld [vmem:[#allocation3] sm:$0xff] }
 0x18d   : > { %358 = vrot.lane.b32.xlu0 %v356_v19, %s582_s11  ;;  %361 = vrot.lane.b32.xlu2 %v356_v19, %s581_s10 }
 0x195   : > { %405 = vrot.lane.b32.xlu2 %v396_v20, %s584_s18 }
 0x19d   : > { %401 = vperm.xlu2 %553, %v398_v21  }
 0x1e7   : > { %v362_v22 = vpop.permute.xlu2 %361 }
 0x1e8   : > { %388 = vmatpush.msra.mxu1 %v362_v22 }
 0x1ef   : > { %v406_v24 = vpop.permute.xlu2 %405 }
 0x1f0   : > { %518 = vmatpush.msk.msra.mxu2 %vm311_vm2, %v406_v24 }
 0x1f1   : > { %519 = vmatmul.msk.f32.vlgmr.msra.gmra.mxu2 %vm407_vm6, %v397_v23 }
 0x1f7   : > { %v402_v28 = vpop.permute.xlu2 %401 }
 0x1ff   : > { %v359_v25 = vpop.permute.xlu0 %358 }
 0x200   : > { %389 = vmatpush.msra.mxu1 %v359_v25 }
 0x202   : > { %390 = vmatpush.msra.mxu1 %v356_v19 }
 0x203   : > { %517 = vmatmul.msk.f32.vlgmr.msra.gmra.mxu1 %vm371_vm7, %v364_v26 }
 0x274   : > { %v430_v27 = vpop.f32.mrf.mxu2 }
 0x275   : > { %v431_v32 = vadd.f32 %v430_v27, %v402_v28 }
 0x280   : > { %v392_v30 = vpop.f32.mrf.mxu1 }
 0x281   : > { %v393_v31 = vadd.f32 %v392_v30, %v369_v29 }
 0x283   : > { %v395_v33 = vmax.f32 %v393_v31, 0.0 }
 0x285   : > { %v433_v34 = vadd.f32 %v431_v32, %v395_v33 }
 0x287   : > { %v434_v35 = vmax.f32 %v433_v34, 0.0 }
 0x289   : > { %436 = vst.msk [vmem:[%s293_s9] sm:$0xff] %vm435_vm8, %v434_v35 }
 0x28a PF: > { %s17_s26 = sadd.s32 1, %s577_s26   ;;  %s693_s24 = smov %s573_s25 }
 0x28b   : > { %p14_p5 = scmp.ge.s32.totalorder %s17_s26, 4   ;;  %s694_s25 = smov %s696_s27 }
 0x28d   :  { %16 = sbr.rel (!%p14_p5) target bundleno = 2 (0x2), region = 78 }

</bundles_post_ra>
